<compile_context>
chip_gen: v7x
topology: tpu7x:2x2x1
jax: 0.10.0
libtpu: 0.0.40
codegen_flags: <defaults>
</compile_context>

<pallas_src>
import functools

import jax
import jax.numpy as jnp
from jax import lax
from jax.experimental import pallas as pl
from jax.experimental.pallas import tpu as pltpu

EPS = 1e-5


def _accumulate_stats(z, valid, sum_ref, sq_ref):
    """Masked per-feature sum and sum-of-squares over the batch (sublane) axis."""
    zm = z * valid  # zero out padded rows
    sum_ref[...] += jnp.sum(zm, axis=0, keepdims=True)
    sq_ref[...] += jnp.sum(zm * z, axis=0, keepdims=True)


def _finalize_scale_shift(sum_ref, sq_ref, gamma, beta, inv_n):
    """Turn accumulated (sum, sumsq) into BN (scale, shift), stored in place."""
    mean = sum_ref[...] * inv_n
    # Biased variance (PyTorch train-mode normalization); clamp against the
    # (rare) slightly-negative result of the E[z^2]-E[z]^2 cancellation.
    var = jnp.maximum(sq_ref[...] * inv_n - mean * mean, 0.0)
    scale = gamma * lax.rsqrt(var + EPS)
    sum_ref[...] = scale                      # ref now holds scale
    sq_ref[...] = beta - mean * scale         # ref now holds shift


def mlp_kernel(
    x_ref,
    w1_ref, g1_ref, be1_ref,
    w2_ref, g2_ref, be2_ref,
    w3_ref, g3_ref, be3_ref,
    wo_ref, bo_ref,
    out_ref,
    s1a, s1b, s2a, s2b, s3a, s3b, zc_ref,
    *, batch, block_b,
):
    p = pl.program_id(0)   # phase: 0,1,2 compute a layer + its BN stats; 3 writes output
    t = pl.program_id(1)   # batch tile
    inv_n = jnp.float32(1.0 / batch)
    row0 = pl.multiple_of(t * block_b, block_b)

    # Mask of valid (non-padded) rows in this batch tile (used for BN stats only).
    rows = t * block_b + lax.broadcasted_iota(jnp.int32, (block_b, 1), 0)
    valid = (rows < batch).astype(jnp.float32)

    # ---- phase prologue: init / finalize BN statistics ---------------------
    @pl.when((p == 0) & (t == 0))
    def _():
        s1a[...] = jnp.zeros_like(s1a)
        s1b[...] = jnp.zeros_like(s1b)

    @pl.when((p == 1) & (t == 0))
    def _():
        _finalize_scale_shift(s1a, s1b, g1_ref[...], be1_ref[...], inv_n)
        s2a[...] = jnp.zeros_like(s2a)
        s2b[...] = jnp.zeros_like(s2b)

    @pl.when((p == 2) & (t == 0))
    def _():
        _finalize_scale_shift(s2a, s2b, g2_ref[...], be2_ref[...], inv_n)
        s3a[...] = jnp.zeros_like(s3a)
        s3b[...] = jnp.zeros_like(s3b)

    @pl.when((p == 3) & (t == 0))
    def _():
        _finalize_scale_shift(s3a, s3b, g3_ref[...], be3_ref[...], inv_n)

    def bn_tanh(z_bf16, scale_ref, shift_ref):
        # bf16 z (from cache) * f32 scale + f32 shift -> f32; tanh arg in bf16
        # (h feeds a bf16 matmul next, so this only moves the cast earlier).
        a = z_bf16 * scale_ref[...] + shift_ref[...]
        return jnp.tanh(a.astype(jnp.bfloat16))

    # ---- per-phase work: each layer's matmul runs exactly once per row ------
    @pl.when(p == 0)
    def _():
        # No b1: pre-BN bias cancels under training-mode BatchNorm.
        z1 = jnp.dot(x_ref[...], w1_ref[...], preferred_element_type=jnp.float32)
        _accumulate_stats(z1, valid, s1a, s1b)
        zc_ref[pl.ds(row0, block_b), :] = z1.astype(jnp.bfloat16)

    @pl.when(p == 1)
    def _():
        z1 = zc_ref[pl.ds(row0, block_b), :]
        h1 = bn_tanh(z1, s1a, s1b)
        z2 = jnp.dot(h1, w2_ref[...], preferred_element_type=jnp.float32)
        _accumulate_stats(z2, valid, s2a, s2b)
        zc_ref[pl.ds(row0, block_b), :] = z2.astype(jnp.bfloat16)

    @pl.when(p == 2)
    def _():
        z2 = zc_ref[pl.ds(row0, block_b), :]
        h2 = bn_tanh(z2, s2a, s2b)
        z3 = jnp.dot(h2, w3_ref[...], preferred_element_type=jnp.float32)
        _accumulate_stats(z3, valid, s3a, s3b)
        zc_ref[pl.ds(row0, block_b), :64] = z3.astype(jnp.bfloat16)

    @pl.when(p == 3)
    def _():
        z3 = zc_ref[pl.ds(row0, block_b), :64]
        h3 = bn_tanh(z3, s3a, s3b)
        y = jnp.dot(h3, wo_ref[...], preferred_element_type=jnp.float32) + bo_ref[...]
        out_ref[...] = y


def _round_up(x, m):
    return ((x + m - 1) // m) * m


def neural_net_forward(x, params, *, block_b=512):
    """x: (B, 12) float32.  params: dict of weights (bf16) / biases / BN params (f32)."""
    B, F = x.shape
    assert F == 12

    # Cast x once at the caller: halves x's HBM traffic, removes in-kernel cast.
    x = x.astype(jnp.bfloat16)

    # Batch tile: multiple of 16 (bf16 sublane packing), no larger than padded batch.
    tb = _round_up(max(16, min(block_b, _round_up(B, 16))), 16)
    Bp = _round_up(B, tb)
    if Bp != B:
        x = jnp.pad(x, ((0, Bp - B), (0, 0)))
    n_tiles = Bp // tb

    # Generation-aware VMEM budget: ~85% of physical, capped at 100 MiB
    # (=> ~100 MiB on v5e/v6e, ~54 MiB on v7x's 64 MiB). Fallback is v7x-safe.
    try:
        vmem_cap = pltpu.get_tpu_info().vmem_capacity_bytes
    except Exception:
        vmem_cap = 64 << 20
    vmem_limit = min(int(vmem_cap * 0.85), 100 << 20)

    zc_bytes = Bp * 128 * 2  # bf16 pre-activation cache, 256 B/row
    if zc_bytes + (8 << 20) > vmem_limit:
        # TODO(synk): for very large batches spill the pre-activation cache to
        # HBM (or fall back to the recompute scheme) instead of failing.
        raise ValueError(
            f"batch {B} too large for the VMEM-resident activation cache "
            f"({zc_bytes} B needed, limit {vmem_limit} B)")

    args = (
        x,
        params["w1"], params["g1"], params["be1"],
        params["w2"], params["g2"], params["be2"],
        params["w3"], params["g3"], params["be3"],
        params["wo"], params["bo"],
    )

    const = lambda p, t: (0, 0)
    # x is only consumed in phase 0: pin its block to 0 afterwards so it is not
    # re-DMA'd from HBM on every phase.
    in_specs = [pl.BlockSpec((tb, 12), lambda p, t: (jnp.where(p == 0, t, 0), 0))]
    # Weights / BN params: constant block index -> DMA'd once, resident in VMEM.
    in_specs += [pl.BlockSpec(a.shape, const) for a in args[1:]]
    # Output: per-tile block, written only in phase 3 (block index pinned to 0
    # in earlier phases so no spurious writebacks); VMEM residency is O(tb),
    # independent of B.  Lane width kept at 17 (pad to 128 only if the masked
    # store shows up as the bottleneck in a bundle dump).
    out_spec = pl.BlockSpec((tb, 17), lambda p, t: (jnp.where(p == 3, t, 0), 0))

    kernel = functools.partial(mlp_kernel, batch=B, block_b=tb)

    out = pl.pallas_call(
        kernel,
        out_shape=jax.ShapeDtypeStruct((Bp, 17), jnp.float32),
        grid=(4, n_tiles),
        in_specs=in_specs,
        out_specs=out_spec,
        scratch_shapes=[
            pltpu.VMEM((1, 128), jnp.float32), pltpu.VMEM((1, 128), jnp.float32),
            pltpu.VMEM((1, 128), jnp.float32), pltpu.VMEM((1, 128), jnp.float32),
            pltpu.VMEM((1, 64), jnp.float32), pltpu.VMEM((1, 64), jnp.float32),
            pltpu.VMEM((Bp, 128), jnp.bfloat16),   # layer-to-layer pre-activation cache
        ],
        compiler_params=pltpu.CompilerParams(
            # Both axes must be sequential: phase order matters and full-batch
            # BN stats / the activation cache live in shared per-core scratch.
            dimension_semantics=("arbitrary", "arbitrary"),
            vmem_limit_bytes=vmem_limit),
    )(*args)
    return out[:B]


def init_params(key):
    """Deterministic synthetic parameters matching the PyTorch shapes.
    Weights stored as (in, out) = PyTorch weight.T, in bf16 for the MXU;
    biases / BN params as (1, F) in f32.  b1/b2/b3 are generated for fidelity
    but cancel exactly under training-mode BatchNorm (kernel drops them)."""
    ks = jax.random.split(key, 16)

    def lin(kw, kb, fan_in, fan_out):
        bound = 1.0 / jnp.sqrt(fan_in)
        w = jax.random.uniform(kw, (fan_in, fan_out), jnp.float32, -bound, bound)
        b = jax.random.uniform(kb, (1, fan_out), jnp.float32, -bound, bound)
        return w.astype(jnp.bfloat16), b

    w1, b1 = lin(ks[0], ks[1], 12, 128)
    w2, b2 = lin(ks[2], ks[3], 128, 128)
    w3, b3 = lin(ks[4], ks[5], 128, 64)
    wo, bo = lin(ks[6], ks[7], 64, 17)

    def bn(kg, kb, f):
        g = 1.0 + 0.1 * jax.random.normal(kg, (1, f), jnp.float32)
        be = 0.1 * jax.random.normal(kb, (1, f), jnp.float32)
        return g, be

    g1, be1 = bn(ks[8], ks[9], 128)
    g2, be2 = bn(ks[10], ks[11], 128)
    g3, be3 = bn(ks[12], ks[13], 64)

    return dict(
        w1=w1, b1=b1, g1=g1, be1=be1,
        w2=w2, b2=b2, g2=g2, be2=be2,
        w3=w3, b3=b3, g3=g3, be3=be3,
        wo=wo, bo=bo,
    )


def reference_forward(x, p):
    """Pure-JAX reference.  Mirrors the kernel's intentional reduced-precision
    choices (bf16 weights / matmul inputs / tanh argument) but keeps the BN
    normalization path on f32 pre-activations and KEEPS the pre-BN linear
    biases (which cancel exactly under training-mode BatchNorm), so it also
    validates the kernel's bias-dropping."""
    def lin(h, w, b):
        return jnp.dot(h.astype(jnp.bfloat16), w,
                       preferred_element_type=jnp.float32) + b

    def bn_tanh(z, g, b):
        m = jnp.mean(z, axis=0, keepdims=True)
        v = jnp.maximum(jnp.mean(z * z, axis=0, keepdims=True) - m * m, 0.0)
        scale = g * lax.rsqrt(v + EPS)
        return jnp.tanh((z * scale + (b - m * scale)).astype(jnp.bfloat16))

    h = bn_tanh(lin(x, p["w1"], p["b1"]), p["g1"], p["be1"])
    h = bn_tanh(lin(h, p["w2"], p["b2"]), p["g2"], p["be2"])
    h = bn_tanh(lin(h, p["w3"], p["b3"]), p["g3"], p["be3"])
    return lin(h, p["wo"], p["bo"])


if __name__ == "__main__":
    key = jax.random.PRNGKey(0)
    kx, kp, kx2 = jax.random.split(key, 3)
    params = init_params(kp)

    # Small batch with a deliberately tiny tile: exercises multiple batch tiles,
    # padded-row masking of the BN statistics, and the activation cache.
    B = 50
    x = jax.random.normal(kx, (B, 12), jnp.float32)
    out = jax.block_until_ready(neural_net_forward(x, params, block_b=16))
    assert out.shape == (B, 17) and out.dtype == jnp.float32
    ref = reference_forward(x, params)
    # bf16 weights/activations, the bf16 pre-activation cache and the bf16 tanh
    # argument intentionally diverge from an f32 path; per-tile stats summation
    # order also differs from the full-batch reference.  Keep tolerance bf16-wide.
    assert jnp.allclose(out, ref, atol=3e-2, rtol=3e-2), "mismatch vs reference (B=50)"

    # Larger batch through the default (512-row) tile path.
    B2 = 1000
    x2 = jax.random.normal(kx2, (B2, 12), jnp.float32)
    out2 = jax.block_until_ready(neural_net_forward(x2, params))
    assert out2.shape == (B2, 17)
    ref2 = reference_forward(x2, params)
    assert jnp.allclose(out2, ref2, atol=3e-2, rtol=3e-2), "mismatch vs reference (B=1000)"

    print("KERNEL_OK")
</pallas_src>

<mosaic_0001>
module attributes {stable_mosaic.version = 11 : i64} {
  func.func @mlp_kernel(%arg0: i32, %arg1: i32, %arg2: memref<16x12xbf16, #tpu.memory_space<vmem>>, %arg3: memref<12x128xbf16, #tpu.memory_space<vmem>>, %arg4: memref<1x128xf32, #tpu.memory_space<vmem>>, %arg5: memref<1x128xf32, #tpu.memory_space<vmem>>, %arg6: memref<128x128xbf16, #tpu.memory_space<vmem>>, %arg7: memref<1x128xf32, #tpu.memory_space<vmem>>, %arg8: memref<1x128xf32, #tpu.memory_space<vmem>>, %arg9: memref<128x64xbf16, #tpu.memory_space<vmem>>, %arg10: memref<1x64xf32, #tpu.memory_space<vmem>>, %arg11: memref<1x64xf32, #tpu.memory_space<vmem>>, %arg12: memref<64x17xbf16, #tpu.memory_space<vmem>>, %arg13: memref<1x17xf32, #tpu.memory_space<vmem>>, %arg14: memref<16x17xf32, #tpu.memory_space<vmem>>, %arg15: memref<1x128xf32, #tpu.memory_space<vmem>>, %arg16: memref<1x128xf32, #tpu.memory_space<vmem>>, %arg17: memref<1x128xf32, #tpu.memory_space<vmem>>, %arg18: memref<1x128xf32, #tpu.memory_space<vmem>>, %arg19: memref<1x64xf32, #tpu.memory_space<vmem>>, %arg20: memref<1x64xf32, #tpu.memory_space<vmem>>, %arg21: memref<64x128xbf16, #tpu.memory_space<vmem>>) attributes {dimension_semantics = [#tpu.dimension_semantics<arbitrary>, #tpu.dimension_semantics<arbitrary>], iteration_bounds = array<i64: 4, 4>, scalar_prefetch = 0 : i64, scratch_operands = 7 : i64, tpu.core_type = #tpu.core_type<tc>, window_params = [{transform_indices = @transform_0, window_bounds = array<i64: 16, 12>}, {pipeline_mode = #tpu.pipeline_mode<synchronous>, transform_indices = @transform_1, window_bounds = array<i64: 12, 128>}, {pipeline_mode = #tpu.pipeline_mode<synchronous>, transform_indices = @transform_2, window_bounds = array<i64: 1, 128>}, {pipeline_mode = #tpu.pipeline_mode<synchronous>, transform_indices = @transform_3, window_bounds = array<i64: 1, 128>}, {pipeline_mode = #tpu.pipeline_mode<synchronous>, transform_indices = @transform_4, window_bounds = array<i64: 128, 128>}, {pipeline_mode = #tpu.pipeline_mode<synchronous>, transform_indices = @transform_5, window_bounds = array<i64: 1, 128>}, {pipeline_mode = #tpu.pipeline_mode<synchronous>, transform_indices = @transform_6, window_bounds = array<i64: 1, 128>}, {pipeline_mode = #tpu.pipeline_mode<synchronous>, transform_indices = @transform_7, window_bounds = array<i64: 128, 64>}, {pipeline_mode = #tpu.pipeline_mode<synchronous>, transform_indices = @transform_8, window_bounds = array<i64: 1, 64>}, {pipeline_mode = #tpu.pipeline_mode<synchronous>, transform_indices = @transform_9, window_bounds = array<i64: 1, 64>}, {pipeline_mode = #tpu.pipeline_mode<synchronous>, transform_indices = @transform_10, window_bounds = array<i64: 64, 17>}, {pipeline_mode = #tpu.pipeline_mode<synchronous>, transform_indices = @transform_11, window_bounds = array<i64: 1, 17>}, {transform_indices = @transform_12, window_bounds = array<i64: 16, 17>}]} {
    %c16_i32 = arith.constant 16 : i32
    %0 = arith.muli %arg1, %c16_i32 : i32
    %1 = tpu.assume_multiple %0, 16 : i32
    %c16_i32_0 = arith.constant 16 : i32
    %2 = arith.muli %arg1, %c16_i32_0 : i32
    %3 = tpu.iota {dimensions = array<i32: 0>} : vector<16x1xi32>
    %4 = vector.broadcast %2 : i32 to vector<16x1xi32>
    %5 = arith.addi %4, %3 : vector<16x1xi32>
    %c50_i32 = arith.constant 50 : i32
    %6 = vector.broadcast %c50_i32 : i32 to vector<16x1xi32>
    %7 = arith.cmpi slt, %5, %6 : vector<16x1xi32>
    %8 = arith.extui %7 : vector<16x1xi1> to vector<16x1xi32>
    %9 = arith.sitofp %8 : vector<16x1xi32> to vector<16x1xf32>
    %c0_i32 = arith.constant 0 : i32
    %10 = arith.cmpi eq, %arg0, %c0_i32 : i32
    %c0_i32_1 = arith.constant 0 : i32
    %11 = arith.cmpi eq, %arg1, %c0_i32_1 : i32
    %12 = arith.andi %10, %11 : i1
    %13 = arith.extui %12 : i1 to i32
    %c0_i32_2 = arith.constant 0 : i32
    %14 = arith.cmpi ne, %13, %c0_i32_2 : i32
    scf.if %14 {
      %cst_19 = arith.constant 0.000000e+00 : f32
      %42 = vector.broadcast %cst_19 : f32 to vector<1x128xf32>
      %c0 = arith.constant 0 : index
      %c0_20 = arith.constant 0 : index
      %43 = vector.load %arg15[%c0, %c0_20] : memref<1x128xf32, #tpu.memory_space<vmem>>, vector<1x128xf32>
      tpu.vector_store %arg15[%c0, %c0_20], %42 {strides = array<i32>} : memref<1x128xf32, #tpu.memory_space<vmem>>, vector<1x128xf32>,
      %cst_21 = arith.constant 0.000000e+00 : f32
      %44 = vector.broadcast %cst_21 : f32 to vector<1x128xf32>
      %c0_22 = arith.constant 0 : index
      %c0_23 = arith.constant 0 : index
      %45 = vector.load %arg16[%c0_22, %c0_23] : memref<1x128xf32, #tpu.memory_space<vmem>>, vector<1x128xf32>
      tpu.vector_store %arg16[%c0_22, %c0_23], %44 {strides = array<i32>} : memref<1x128xf32, #tpu.memory_space<vmem>>, vector<1x128xf32>,
    } else {
    }
    %c1_i32 = arith.constant 1 : i32
    %15 = arith.cmpi eq, %arg0, %c1_i32 : i32
    %c0_i32_3 = arith.constant 0 : i32
    %16 = arith.cmpi eq, %arg1, %c0_i32_3 : i32
    %17 = arith.andi %15, %16 : i1
    %18 = arith.extui %17 : i1 to i32
    %cst = arith.constant 2.000000e-02 : f32
    %c0_i32_4 = arith.constant 0 : i32
    %19 = arith.cmpi ne, %18, %c0_i32_4 : i32
    scf.if %19 {
      %c0 = arith.constant 0 : index
      %c0_19 = arith.constant 0 : index
      %42 = vector.load %arg4[%c0, %c0_19] : memref<1x128xf32, #tpu.memory_space<vmem>>, vector<1x128xf32>
      %c0_20 = arith.constant 0 : index
      %c0_21 = arith.constant 0 : index
      %43 = vector.load %arg5[%c0_20, %c0_21] : memref<1x128xf32, #tpu.memory_space<vmem>>, vector<1x128xf32>
      %c0_22 = arith.constant 0 : index
      %c0_23 = arith.constant 0 : index
      %44 = vector.load %arg15[%c0_22, %c0_23] : memref<1x128xf32, #tpu.memory_space<vmem>>, vector<1x128xf32>
      %45 = vector.broadcast %cst : f32 to vector<1x128xf32>
      %46 = arith.mulf %44, %45 : vector<1x128xf32>
      %c0_24 = arith.constant 0 : index
      %c0_25 = arith.constant 0 : index
      %47 = vector.load %arg16[%c0_24, %c0_25] : memref<1x128xf32, #tpu.memory_space<vmem>>, vector<1x128xf32>
      %48 = vector.broadcast %cst : f32 to vector<1x128xf32>
      %49 = arith.mulf %47, %48 : vector<1x128xf32>
      %50 = arith.mulf %46, %46 : vector<1x128xf32>
      %51 = arith.subf %49, %50 : vector<1x128xf32>
      %cst_26 = arith.constant 0.000000e+00 : f32
      %52 = vector.broadcast %cst_26 : f32 to vector<1x128xf32>
      %53 = arith.maximumf %51, %52 : vector<1x128xf32>
      %cst_27 = arith.constant 9.99999974E-6 : f32
      %54 = vector.broadcast %cst_27 : f32 to vector<1x128xf32>
      %55 = arith.addf %53, %54 : vector<1x128xf32>
      %56 = math.rsqrt %55 : vector<1x128xf32>
      %57 = arith.mulf %42, %56 : vector<1x128xf32>
      %c0_28 = arith.constant 0 : index
      %c0_29 = arith.constant 0 : index
      %58 = vector.load %arg15[%c0_28, %c0_29] : memref<1x128xf32, #tpu.memory_space<vmem>>, vector<1x128xf32>
      tpu.vector_store %arg15[%c0_28, %c0_29], %57 {strides = array<i32>} : memref<1x128xf32, #tpu.memory_space<vmem>>, vector<1x128xf32>,
      %59 = arith.mulf %46, %57 : vector<1x128xf32>
      %60 = arith.subf %43, %59 : vector<1x128xf32>
      %c0_30 = arith.constant 0 : index
      %c0_31 = arith.constant 0 : index
      %61 = vector.load %arg16[%c0_30, %c0_31] : memref<1x128xf32, #tpu.memory_space<vmem>>, vector<1x128xf32>
      tpu.vector_store %arg16[%c0_30, %c0_31], %60 {strides = array<i32>} : memref<1x128xf32, #tpu.memory_space<vmem>>, vector<1x128xf32>,
      %cst_32 = arith.constant 0.000000e+00 : f32
      %62 = vector.broadcast %cst_32 : f32 to vector<1x128xf32>
      %c0_33 = arith.constant 0 : index
      %c0_34 = arith.constant 0 : index
      %63 = vector.load %arg17[%c0_33, %c0_34] : memref<1x128xf32, #tpu.memory_space<vmem>>, vector<1x128xf32>
      tpu.vector_store %arg17[%c0_33, %c0_34], %62 {strides = array<i32>} : memref<1x128xf32, #tpu.memory_space<vmem>>, vector<1x128xf32>,
      %cst_35 = arith.constant 0.000000e+00 : f32
      %64 = vector.broadcast %cst_35 : f32 to vector<1x128xf32>
      %c0_36 = arith.constant 0 : index
      %c0_37 = arith.constant 0 : index
      %65 = vector.load %arg18[%c0_36, %c0_37] : memref<1x128xf32, #tpu.memory_space<vmem>>, vector<1x128xf32>
      tpu.vector_store %arg18[%c0_36, %c0_37], %64 {strides = array<i32>} : memref<1x128xf32, #tpu.memory_space<vmem>>, vector<1x128xf32>,
    } else {
    }
    %c2_i32 = arith.constant 2 : i32
    %20 = arith.cmpi eq, %arg0, %c2_i32 : i32
    %c0_i32_5 = arith.constant 0 : i32
    %21 = arith.cmpi eq, %arg1, %c0_i32_5 : i32
    %22 = arith.andi %20, %21 : i1
    %23 = arith.extui %22 : i1 to i32
    %cst_6 = arith.constant 2.000000e-02 : f32
    %c0_i32_7 = arith.constant 0 : i32
    %24 = arith.cmpi ne, %23, %c0_i32_7 : i32
    scf.if %24 {
      %c0 = arith.constant 0 : index
      %c0_19 = arith.constant 0 : index
      %42 = vector.load %arg7[%c0, %c0_19] : memref<1x128xf32, #tpu.memory_space<vmem>>, vector<1x128xf32>
      %c0_20 = arith.constant 0 : index
      %c0_21 = arith.constant 0 : index
      %43 = vector.load %arg8[%c0_20, %c0_21] : memref<1x128xf32, #tpu.memory_space<vmem>>, vector<1x128xf32>
      %c0_22 = arith.constant 0 : index
      %c0_23 = arith.constant 0 : index
      %44 = vector.load %arg17[%c0_22, %c0_23] : memref<1x128xf32, #tpu.memory_space<vmem>>, vector<1x128xf32>
      %45 = vector.broadcast %cst_6 : f32 to vector<1x128xf32>
      %46 = arith.mulf %44, %45 : vector<1x128xf32>
      %c0_24 = arith.constant 0 : index
      %c0_25 = arith.constant 0 : index
      %47 = vector.load %arg18[%c0_24, %c0_25] : memref<1x128xf32, #tpu.memory_space<vmem>>, vector<1x128xf32>
      %48 = vector.broadcast %cst_6 : f32 to vector<1x128xf32>
      %49 = arith.mulf %47, %48 : vector<1x128xf32>
      %50 = arith.mulf %46, %46 : vector<1x128xf32>
      %51 = arith.subf %49, %50 : vector<1x128xf32>
      %cst_26 = arith.constant 0.000000e+00 : f32
      %52 = vector.broadcast %cst_26 : f32 to vector<1x128xf32>
      %53 = arith.maximumf %51, %52 : vector<1x128xf32>
      %cst_27 = arith.constant 9.99999974E-6 : f32
      %54 = vector.broadcast %cst_27 : f32 to vector<1x128xf32>
      %55 = arith.addf %53, %54 : vector<1x128xf32>
      %56 = math.rsqrt %55 : vector<1x128xf32>
      %57 = arith.mulf %42, %56 : vector<1x128xf32>
      %c0_28 = arith.constant 0 : index
      %c0_29 = arith.constant 0 : index
      %58 = vector.load %arg17[%c0_28, %c0_29] : memref<1x128xf32, #tpu.memory_space<vmem>>, vector<1x128xf32>
      tpu.vector_store %arg17[%c0_28, %c0_29], %57 {strides = array<i32>} : memref<1x128xf32, #tpu.memory_space<vmem>>, vector<1x128xf32>,
      %59 = arith.mulf %46, %57 : vector<1x128xf32>
      %60 = arith.subf %43, %59 : vector<1x128xf32>
      %c0_30 = arith.constant 0 : index
      %c0_31 = arith.constant 0 : index
      %61 = vector.load %arg18[%c0_30, %c0_31] : memref<1x128xf32, #tpu.memory_space<vmem>>, vector<1x128xf32>
      tpu.vector_store %arg18[%c0_30, %c0_31], %60 {strides = array<i32>} : memref<1x128xf32, #tpu.memory_space<vmem>>, vector<1x128xf32>,
      %cst_32 = arith.constant 0.000000e+00 : f32
      %62 = vector.broadcast %cst_32 : f32 to vector<1x64xf32>
      %c0_33 = arith.constant 0 : index
      %c0_34 = arith.constant 0 : index
      %63 = vector.load %arg19[%c0_33, %c0_34] : memref<1x64xf32, #tpu.memory_space<vmem>>, vector<1x64xf32>
      tpu.vector_store %arg19[%c0_33, %c0_34], %62 {strides = array<i32>} : memref<1x64xf32, #tpu.memory_space<vmem>>, vector<1x64xf32>,
      %cst_35 = arith.constant 0.000000e+00 : f32
      %64 = vector.broadcast %cst_35 : f32 to vector<1x64xf32>
      %c0_36 = arith.constant 0 : index
      %c0_37 = arith.constant 0 : index
      %65 = vector.load %arg20[%c0_36, %c0_37] : memref<1x64xf32, #tpu.memory_space<vmem>>, vector<1x64xf32>
      tpu.vector_store %arg20[%c0_36, %c0_37], %64 {strides = array<i32>} : memref<1x64xf32, #tpu.memory_space<vmem>>, vector<1x64xf32>,
    } else {
    }
    %c3_i32 = arith.constant 3 : i32
    %25 = arith.cmpi eq, %arg0, %c3_i32 : i32
    %c0_i32_8 = arith.constant 0 : i32
    %26 = arith.cmpi eq, %arg1, %c0_i32_8 : i32
    %27 = arith.andi %25, %26 : i1
    %28 = arith.extui %27 : i1 to i32
    %cst_9 = arith.constant 2.000000e-02 : f32
    %c0_i32_10 = arith.constant 0 : i32
    %29 = arith.cmpi ne, %28, %c0_i32_10 : i32
    scf.if %29 {
      %c0 = arith.constant 0 : index
      %c0_19 = arith.constant 0 : index
      %42 = vector.load %arg10[%c0, %c0_19] : memref<1x64xf32, #tpu.memory_space<vmem>>, vector<1x64xf32>
      %c0_20 = arith.constant 0 : index
      %c0_21 = arith.constant 0 : index
      %43 = vector.load %arg11[%c0_20, %c0_21] : memref<1x64xf32, #tpu.memory_space<vmem>>, vector<1x64xf32>
      %c0_22 = arith.constant 0 : index
      %c0_23 = arith.constant 0 : index
      %44 = vector.load %arg19[%c0_22, %c0_23] : memref<1x64xf32, #tpu.memory_space<vmem>>, vector<1x64xf32>
      %45 = vector.broadcast %cst_9 : f32 to vector<1x64xf32>
      %46 = arith.mulf %44, %45 : vector<1x64xf32>
      %c0_24 = arith.constant 0 : index
      %c0_25 = arith.constant 0 : index
      %47 = vector.load %arg20[%c0_24, %c0_25] : memref<1x64xf32, #tpu.memory_space<vmem>>, vector<1x64xf32>
      %48 = vector.broadcast %cst_9 : f32 to vector<1x64xf32>
      %49 = arith.mulf %47, %48 : vector<1x64xf32>
      %50 = arith.mulf %46, %46 : vector<1x64xf32>
      %51 = arith.subf %49, %50 : vector<1x64xf32>
      %cst_26 = arith.constant 0.000000e+00 : f32
      %52 = vector.broadcast %cst_26 : f32 to vector<1x64xf32>
      %53 = arith.maximumf %51, %52 : vector<1x64xf32>
      %cst_27 = arith.constant 9.99999974E-6 : f32
      %54 = vector.broadcast %cst_27 : f32 to vector<1x64xf32>
      %55 = arith.addf %53, %54 : vector<1x64xf32>
      %56 = math.rsqrt %55 : vector<1x64xf32>
      %57 = arith.mulf %42, %56 : vector<1x64xf32>
      %c0_28 = arith.constant 0 : index
      %c0_29 = arith.constant 0 : index
      %58 = vector.load %arg19[%c0_28, %c0_29] : memref<1x64xf32, #tpu.memory_space<vmem>>, vector<1x64xf32>
      tpu.vector_store %arg19[%c0_28, %c0_29], %57 {strides = array<i32>} : memref<1x64xf32, #tpu.memory_space<vmem>>, vector<1x64xf32>,
      %59 = arith.mulf %46, %57 : vector<1x64xf32>
      %60 = arith.subf %43, %59 : vector<1x64xf32>
      %c0_30 = arith.constant 0 : index
      %c0_31 = arith.constant 0 : index
      %61 = vector.load %arg20[%c0_30, %c0_31] : memref<1x64xf32, #tpu.memory_space<vmem>>, vector<1x64xf32>
      tpu.vector_store %arg20[%c0_30, %c0_31], %60 {strides = array<i32>} : memref<1x64xf32, #tpu.memory_space<vmem>>, vector<1x64xf32>,
    } else {
    }
    %c0_i32_11 = arith.constant 0 : i32
    %30 = arith.cmpi eq, %arg0, %c0_i32_11 : i32
    %31 = arith.extui %30 : i1 to i32
    %c0_i32_12 = arith.constant 0 : i32
    %32 = arith.cmpi ne, %31, %c0_i32_12 : i32
    scf.if %32 {
      %c0 = arith.constant 0 : index
      %c0_19 = arith.constant 0 : index
      %42 = vector.load %arg2[%c0, %c0_19] : memref<16x12xbf16, #tpu.memory_space<vmem>>, vector<16x12xbf16>
      %c0_20 = arith.constant 0 : index
      %c0_21 = arith.constant 0 : index
      %43 = vector.load %arg3[%c0_20, %c0_21] : memref<12x128xbf16, #tpu.memory_space<vmem>>, vector<12x128xbf16>
      %cst_22 = arith.constant dense<0.000000e+00> : vector<16x128xf32>
      %44 = tpu.matmul %42, %43, %cst_22 {dimension_numbers = #tpu.dot_dimension_numbers<[1], [0], [0], [1], [0, 0, 1, 1], [], []>} : vector<16x12xbf16>, vector<12x128xbf16>, vector<16x128xf32> -> vector<16x128xf32>
      %45 = vector.broadcast %9 : vector<16x1xf32> to vector<16x128xf32>
      %46 = arith.mulf %44, %45 : vector<16x128xf32>
      %c0_23 = arith.constant 0 : index
      %c0_24 = arith.constant 0 : index
      %47 = vector.load %arg15[%c0_23, %c0_24] : memref<1x128xf32, #tpu.memory_space<vmem>>, vector<1x128xf32>
      %cst_25 = arith.constant dense<0.000000e+00> : vector<128xf32>
      %48 = vector.multi_reduction <add>, %46, %cst_25 [0] : vector<16x128xf32> to vector<128xf32>
      %49 = vector.shape_cast %48 : vector<128xf32> to vector<1x128xf32>
      %50 = arith.addf %47, %49 : vector<1x128xf32>
      %c0_26 = arith.constant 0 : index
      %c0_27 = arith.constant 0 : index
      %51 = vector.load %arg15[%c0_26, %c0_27] : memref<1x128xf32, #tpu.memory_space<vmem>>, vector<1x128xf32>
      tpu.vector_store %arg15[%c0_26, %c0_27], %50 {strides = array<i32>} : memref<1x128xf32, #tpu.memory_space<vmem>>, vector<1x128xf32>,
      %c0_28 = arith.constant 0 : index
      %c0_29 = arith.constant 0 : index
      %52 = vector.load %arg16[%c0_28, %c0_29] : memref<1x128xf32, #tpu.memory_space<vmem>>, vector<1x128xf32>
      %53 = arith.mulf %46, %44 : vector<16x128xf32>
      %cst_30 = arith.constant dense<0.000000e+00> : vector<128xf32>
      %54 = vector.multi_reduction <add>, %53, %cst_30 [0] : vector<16x128xf32> to vector<128xf32>
      %55 = vector.shape_cast %54 : vector<128xf32> to vector<1x128xf32>
      %56 = arith.addf %52, %55 : vector<1x128xf32>
      %c0_31 = arith.constant 0 : index
      %c0_32 = arith.constant 0 : index
      %57 = vector.load %arg16[%c0_31, %c0_32] : memref<1x128xf32, #tpu.memory_space<vmem>>, vector<1x128xf32>
      tpu.vector_store %arg16[%c0_31, %c0_32], %56 {strides = array<i32>} : memref<1x128xf32, #tpu.memory_space<vmem>>, vector<1x128xf32>,
      %58 = arith.truncf %44 : vector<16x128xf32> to vector<16x128xbf16>
      %59 = arith.index_cast %1 : i32 to index
      %c0_33 = arith.constant 0 : index
      %60 = vector.load %arg21[%59, %c0_33] : memref<64x128xbf16, #tpu.memory_space<vmem>>, vector<16x128xbf16>
      tpu.vector_store %arg21[%59, %c0_33], %58 {strides = array<i32>} : memref<64x128xbf16, #tpu.memory_space<vmem>>, vector<16x128xbf16>,
    } else {
    }
    %c1_i32_13 = arith.constant 1 : i32
    %33 = arith.cmpi eq, %arg0, %c1_i32_13 : i32
    %34 = arith.extui %33 : i1 to i32
    %c0_i32_14 = arith.constant 0 : i32
    %35 = arith.cmpi ne, %34, %c0_i32_14 : i32
    scf.if %35 {
      %42 = arith.index_cast %1 : i32 to index
      %c0 = arith.constant 0 : index
      %43 = vector.load %arg21[%42, %c0] : memref<64x128xbf16, #tpu.memory_space<vmem>>, vector<16x128xbf16>
      %c0_19 = arith.constant 0 : index
      %c0_20 = arith.constant 0 : index
      %44 = vector.load %arg15[%c0_19, %c0_20] : memref<1x128xf32, #tpu.memory_space<vmem>>, vector<1x128xf32>
      %45 = arith.extf %43 : vector<16x128xbf16> to vector<16x128xf32>
      %46 = vector.broadcast %44 : vector<1x128xf32> to vector<16x128xf32>
      %47 = arith.mulf %45, %46 : vector<16x128xf32>
      %c0_21 = arith.constant 0 : index
      %c0_22 = arith.constant 0 : index
      %48 = vector.load %arg16[%c0_21, %c0_22] : memref<1x128xf32, #tpu.memory_space<vmem>>, vector<1x128xf32>
      %49 = vector.broadcast %48 : vector<1x128xf32> to vector<16x128xf32>
      %50 = arith.addf %47, %49 : vector<16x128xf32>
      %51 = arith.truncf %50 : vector<16x128xf32> to vector<16x128xbf16>
      %52 = math.tanh %51 : vector<16x128xbf16>
      %c0_23 = arith.constant 0 : index
      %c0_24 = arith.constant 0 : index
      %53 = vector.load %arg6[%c0_23, %c0_24] : memref<128x128xbf16, #tpu.memory_space<vmem>>, vector<128x128xbf16>
      %cst_25 = arith.constant dense<0.000000e+00> : vector<16x128xf32>
      %54 = tpu.matmul %52, %53, %cst_25 {dimension_numbers = #tpu.dot_dimension_numbers<[1], [0], [0], [1], [0, 0, 1, 1], [], []>} : vector<16x128xbf16>, vector<128x128xbf16>, vector<16x128xf32> -> vector<16x128xf32>
      %55 = vector.broadcast %9 : vector<16x1xf32> to vector<16x128xf32>
      %56 = arith.mulf %54, %55 : vector<16x128xf32>
      %c0_26 = arith.constant 0 : index
      %c0_27 = arith.constant 0 : index
      %57 = vector.load %arg17[%c0_26, %c0_27] : memref<1x128xf32, #tpu.memory_space<vmem>>, vector<1x128xf32>
      %cst_28 = arith.constant dense<0.000000e+00> : vector<128xf32>
      %58 = vector.multi_reduction <add>, %56, %cst_28 [0] : vector<16x128xf32> to vector<128xf32>
      %59 = vector.shape_cast %58 : vector<128xf32> to vector<1x128xf32>
      %60 = arith.addf %57, %59 : vector<1x128xf32>
      %c0_29 = arith.constant 0 : index
      %c0_30 = arith.constant 0 : index
      %61 = vector.load %arg17[%c0_29, %c0_30] : memref<1x128xf32, #tpu.memory_space<vmem>>, vector<1x128xf32>
      tpu.vector_store %arg17[%c0_29, %c0_30], %60 {strides = array<i32>} : memref<1x128xf32, #tpu.memory_space<vmem>>, vector<1x128xf32>,
      %c0_31 = arith.constant 0 : index
      %c0_32 = arith.constant 0 : index
      %62 = vector.load %arg18[%c0_31, %c0_32] : memref<1x128xf32, #tpu.memory_space<vmem>>, vector<1x128xf32>
      %63 = arith.mulf %56, %54 : vector<16x128xf32>
      %cst_33 = arith.constant dense<0.000000e+00> : vector<128xf32>
      %64 = vector.multi_reduction <add>, %63, %cst_33 [0] : vector<16x128xf32> to vector<128xf32>
      %65 = vector.shape_cast %64 : vector<128xf32> to vector<1x128xf32>
      %66 = arith.addf %62, %65 : vector<1x128xf32>
      %c0_34 = arith.constant 0 : index
      %c0_35 = arith.constant 0 : index
      %67 = vector.load %arg18[%c0_34, %c0_35] : memref<1x128xf32, #tpu.memory_space<vmem>>, vector<1x128xf32>
      tpu.vector_store %arg18[%c0_34, %c0_35], %66 {strides = array<i32>} : memref<1x128xf32, #tpu.memory_space<vmem>>, vector<1x128xf32>,
      %68 = arith.truncf %54 : vector<16x128xf32> to vector<16x128xbf16>
      %69 = arith.index_cast %1 : i32 to index
      %c0_36 = arith.constant 0 : index
      %70 = vector.load %arg21[%69, %c0_36] : memref<64x128xbf16, #tpu.memory_space<vmem>>, vector<16x128xbf16>
      tpu.vector_store %arg21[%69, %c0_36], %68 {strides = array<i32>} : memref<64x128xbf16, #tpu.memory_space<vmem>>, vector<16x128xbf16>,
    } else {
    }
    %c2_i32_15 = arith.constant 2 : i32
    %36 = arith.cmpi eq, %arg0, %c2_i32_15 : i32
    %37 = arith.extui %36 : i1 to i32
    %c0_i32_16 = arith.constant 0 : i32
    %38 = arith.cmpi ne, %37, %c0_i32_16 : i32
    scf.if %38 {
      %42 = arith.index_cast %1 : i32 to index
      %c0 = arith.constant 0 : index
      %43 = vector.load %arg21[%42, %c0] : memref<64x128xbf16, #tpu.memory_space<vmem>>, vector<16x128xbf16>
      %c0_19 = arith.constant 0 : index
      %c0_20 = arith.constant 0 : index
      %44 = vector.load %arg17[%c0_19, %c0_20] : memref<1x128xf32, #tpu.memory_space<vmem>>, vector<1x128xf32>
      %45 = arith.extf %43 : vector<16x128xbf16> to vector<16x128xf32>
      %46 = vector.broadcast %44 : vector<1x128xf32> to vector<16x128xf32>
      %47 = arith.mulf %45, %46 : vector<16x128xf32>
      %c0_21 = arith.constant 0 : index
      %c0_22 = arith.constant 0 : index
      %48 = vector.load %arg18[%c0_21, %c0_22] : memref<1x128xf32, #tpu.memory_space<vmem>>, vector<1x128xf32>
      %49 = vector.broadcast %48 : vector<1x128xf32> to vector<16x128xf32>
      %50 = arith.addf %47, %49 : vector<16x128xf32>
      %51 = arith.truncf %50 : vector<16x128xf32> to vector<16x128xbf16>
      %52 = math.tanh %51 : vector<16x128xbf16>
      %c0_23 = arith.constant 0 : index
      %c0_24 = arith.constant 0 : index
      %53 = vector.load %arg9[%c0_23, %c0_24] : memref<128x64xbf16, #tpu.memory_space<vmem>>, vector<128x64xbf16>
      %cst_25 = arith.constant dense<0.000000e+00> : vector<16x64xf32>
      %54 = tpu.matmul %52, %53, %cst_25 {dimension_numbers = #tpu.dot_dimension_numbers<[1], [0], [0], [1], [0, 0, 1, 1], [], []>} : vector<16x128xbf16>, vector<128x64xbf16>, vector<16x64xf32> -> vector<16x64xf32>
      %55 = vector.broadcast %9 : vector<16x1xf32> to vector<16x64xf32>
      %56 = arith.mulf %54, %55 : vector<16x64xf32>
      %c0_26 = arith.constant 0 : index
      %c0_27 = arith.constant 0 : index
      %57 = vector.load %arg19[%c0_26, %c0_27] : memref<1x64xf32, #tpu.memory_space<vmem>>, vector<1x64xf32>
      %cst_28 = arith.constant dense<0.000000e+00> : vector<64xf32>
      %58 = vector.multi_reduction <add>, %56, %cst_28 [0] : vector<16x64xf32> to vector<64xf32>
      %59 = vector.shape_cast %58 : vector<64xf32> to vector<1x64xf32>
      %60 = arith.addf %57, %59 : vector<1x64xf32>
      %c0_29 = arith.constant 0 : index
      %c0_30 = arith.constant 0 : index
      %61 = vector.load %arg19[%c0_29, %c0_30] : memref<1x64xf32, #tpu.memory_space<vmem>>, vector<1x64xf32>
      tpu.vector_store %arg19[%c0_29, %c0_30], %60 {strides = array<i32>} : memref<1x64xf32, #tpu.memory_space<vmem>>, vector<1x64xf32>,
      %c0_31 = arith.constant 0 : index
      %c0_32 = arith.constant 0 : index
      %62 = vector.load %arg20[%c0_31, %c0_32] : memref<1x64xf32, #tpu.memory_space<vmem>>, vector<1x64xf32>
      %63 = arith.mulf %56, %54 : vector<16x64xf32>
      %cst_33 = arith.constant dense<0.000000e+00> : vector<64xf32>
      %64 = vector.multi_reduction <add>, %63, %cst_33 [0] : vector<16x64xf32> to vector<64xf32>
      %65 = vector.shape_cast %64 : vector<64xf32> to vector<1x64xf32>
      %66 = arith.addf %62, %65 : vector<1x64xf32>
      %c0_34 = arith.constant 0 : index
      %c0_35 = arith.constant 0 : index
      %67 = vector.load %arg20[%c0_34, %c0_35] : memref<1x64xf32, #tpu.memory_space<vmem>>, vector<1x64xf32>
      tpu.vector_store %arg20[%c0_34, %c0_35], %66 {strides = array<i32>} : memref<1x64xf32, #tpu.memory_space<vmem>>, vector<1x64xf32>,
      %68 = arith.truncf %54 : vector<16x64xf32> to vector<16x64xbf16>
      %69 = arith.index_cast %1 : i32 to index
      %c0_36 = arith.constant 0 : index
      %70 = vector.load %arg21[%69, %c0_36] : memref<64x128xbf16, #tpu.memory_space<vmem>>, vector<16x64xbf16>
      tpu.vector_store %arg21[%69, %c0_36], %68 {strides = array<i32>} : memref<64x128xbf16, #tpu.memory_space<vmem>>, vector<16x64xbf16>,
    } else {
    }
    %c3_i32_17 = arith.constant 3 : i32
    %39 = arith.cmpi eq, %arg0, %c3_i32_17 : i32
    %40 = arith.extui %39 : i1 to i32
    %c0_i32_18 = arith.constant 0 : i32
    %41 = arith.cmpi ne, %40, %c0_i32_18 : i32
    scf.if %41 {
      %42 = arith.index_cast %1 : i32 to index
      %c0 = arith.constant 0 : index
      %43 = vector.load %arg21[%42, %c0] : memref<64x128xbf16, #tpu.memory_space<vmem>>, vector<16x64xbf16>
      %c0_19 = arith.constant 0 : index
      %c0_20 = arith.constant 0 : index
      %44 = vector.load %arg19[%c0_19, %c0_20] : memref<1x64xf32, #tpu.memory_space<vmem>>, vector<1x64xf32>
      %45 = arith.extf %43 : vector<16x64xbf16> to vector<16x64xf32>
      %46 = vector.broadcast %44 : vector<1x64xf32> to vector<16x64xf32>
      %47 = arith.mulf %45, %46 : vector<16x64xf32>
      %c0_21 = arith.constant 0 : index
      %c0_22 = arith.constant 0 : index
      %48 = vector.load %arg20[%c0_21, %c0_22] : memref<1x64xf32, #tpu.memory_space<vmem>>, vector<1x64xf32>
      %49 = vector.broadcast %48 : vector<1x64xf32> to vector<16x64xf32>
      %50 = arith.addf %47, %49 : vector<16x64xf32>
      %51 = arith.truncf %50 : vector<16x64xf32> to vector<16x64xbf16>
      %52 = math.tanh %51 : vector<16x64xbf16>
      %c0_23 = arith.constant 0 : index
      %c0_24 = arith.constant 0 : index
      %53 = vector.load %arg12[%c0_23, %c0_24] : memref<64x17xbf16, #tpu.memory_space<vmem>>, vector<64x17xbf16>
      %cst_25 = arith.constant dense<0.000000e+00> : vector<16x17xf32>
      %54 = tpu.matmul %52, %53, %cst_25 {dimension_numbers = #tpu.dot_dimension_numbers<[1], [0], [0], [1], [0, 0, 1, 1], [], []>} : vector<16x64xbf16>, vector<64x17xbf16>, vector<16x17xf32> -> vector<16x17xf32>
      %c0_26 = arith.constant 0 : index
      %c0_27 = arith.constant 0 : index
      %55 = vector.load %arg13[%c0_26, %c0_27] : memref<1x17xf32, #tpu.memory_space<vmem>>, vector<1x17xf32>
      %56 = vector.broadcast %55 : vector<1x17xf32> to vector<16x17xf32>
      %57 = arith.addf %54, %56 : vector<16x17xf32>
      %c0_28 = arith.constant 0 : index
      %c0_29 = arith.constant 0 : index
      %58 = vector.load %arg14[%c0_28, %c0_29] : memref<16x17xf32, #tpu.memory_space<vmem>>, vector<16x17xf32>
      tpu.vector_store %arg14[%c0_28, %c0_29], %57 {strides = array<i32>} : memref<16x17xf32, #tpu.memory_space<vmem>>, vector<16x17xf32>,
    } else {
    }
    return
  }
  func.func @transform_0(%arg0: i32, %arg1: i32) -> (i32, i32) {
    %c0_i32 = arith.constant 0 : i32
    %0 = arith.cmpi eq, %arg0, %c0_i32 : i32
    %c0_i32_0 = arith.constant 0 : i32
    %1 = arith.select %0, %arg1, %c0_i32_0 : i32
    %c0_i32_1 = arith.constant 0 : i32
    %c0_i32_2 = arith.constant 0 : i32
    return %1, %c0_i32_1 : i32, i32
  }
  func.func @transform_1(%arg0: i32, %arg1: i32) -> (i32, i32) {
    %c0_i32 = arith.constant 0 : i32
    %c0_i32_0 = arith.constant 0 : i32
    %c0_i32_1 = arith.constant 0 : i32
    return %c0_i32, %c0_i32_0 : i32, i32
  }
  func.func @transform_2(%arg0: i32, %arg1: i32) -> (i32, i32) {
    %c0_i32 = arith.constant 0 : i32
    %c0_i32_0 = arith.constant 0 : i32
    %c0_i32_1 = arith.constant 0 : i32
    return %c0_i32, %c0_i32_0 : i32, i32
  }
  func.func @transform_3(%arg0: i32, %arg1: i32) -> (i32, i32) {
    %c0_i32 = arith.constant 0 : i32
    %c0_i32_0 = arith.constant 0 : i32
    %c0_i32_1 = arith.constant 0 : i32
    return %c0_i32, %c0_i32_0 : i32, i32
  }
  func.func @transform_4(%arg0: i32, %arg1: i32) -> (i32, i32) {
    %c0_i32 = arith.constant 0 : i32
    %c0_i32_0 = arith.constant 0 : i32
    %c0_i32_1 = arith.constant 0 : i32
    return %c0_i32, %c0_i32_0 : i32, i32
  }
  func.func @transform_5(%arg0: i32, %arg1: i32) -> (i32, i32) {
    %c0_i32 = arith.constant 0 : i32
    %c0_i32_0 = arith.constant 0 : i32
    %c0_i32_1 = arith.constant 0 : i32
    return %c0_i32, %c0_i32_0 : i32, i32
  }
  func.func @transform_6(%arg0: i32, %arg1: i32) -> (i32, i32) {
    %c0_i32 = arith.constant 0 : i32
    %c0_i32_0 = arith.constant 0 : i32
    %c0_i32_1 = arith.constant 0 : i32
    return %c0_i32, %c0_i32_0 : i32, i32
  }
  func.func @transform_7(%arg0: i32, %arg1: i32) -> (i32, i32) {
    %c0_i32 = arith.constant 0 : i32
    %c0_i32_0 = arith.constant 0 : i32
    %c0_i32_1 = arith.constant 0 : i32
    return %c0_i32, %c0_i32_0 : i32, i32
  }
  func.func @transform_8(%arg0: i32, %arg1: i32) -> (i32, i32) {
    %c0_i32 = arith.constant 0 : i32
    %c0_i32_0 = arith.constant 0 : i32
    %c0_i32_1 = arith.constant 0 : i32
    return %c0_i32, %c0_i32_0 : i32, i32
  }
  func.func @transform_9(%arg0: i32, %arg1: i32) -> (i32, i32) {
    %c0_i32 = arith.constant 0 : i32
    %c0_i32_0 = arith.constant 0 : i32
    %c0_i32_1 = arith.constant 0 : i32
    return %c0_i32, %c0_i32_0 : i32, i32
  }
  func.func @transform_10(%arg0: i32, %arg1: i32) -> (i32, i32) {
    %c0_i32 = arith.constant 0 : i32
    %c0_i32_0 = arith.constant 0 : i32
    %c0_i32_1 = arith.constant 0 : i32
    return %c0_i32, %c0_i32_0 : i32, i32
  }
  func.func @transform_11(%arg0: i32, %arg1: i32) -> (i32, i32) {
    %c0_i32 = arith.constant 0 : i32
    %c0_i32_0 = arith.constant 0 : i32
    %c0_i32_1 = arith.constant 0 : i32
    return %c0_i32, %c0_i32_0 : i32, i32
  }
  func.func @transform_12(%arg0: i32, %arg1: i32) -> (i32, i32) {
    %c3_i32 = arith.constant 3 : i32
    %0 = arith.cmpi eq, %arg0, %c3_i32 : i32
    %c0_i32 = arith.constant 0 : i32
    %1 = arith.select %0, %arg1, %c0_i32 : i32
    %c0_i32_0 = arith.constant 0 : i32
    %c0_i32_1 = arith.constant 0 : i32
    return %1, %c0_i32_0 : i32, i32
  }
}

</mosaic_0001>

<bundles_post_ra>
// kernel: tpu_custom_call.1
= control target key start
LH: loop header
LB: loop body
LE: loop exit
PB: predicated region body
PF: predicated region fallthrough
CT: control target
= control target key end

     0   :  { %s1506_s21 = smov 0   ;;  %s1508_s22 = smov 0   ;;  %s1713_s0 = inlined_call_operand.vmem [shape: bf16[64,12], index: 0, kind: input, shape index: {}]   ;;  %s1714_s1 = inlined_call_operand.vmem [shape: bf16[12,128], index: 1, kind: input, shape index: {}]   ;;  %s1715_s2 = inlined_call_operand.vmem [shape: f32[1,128], index: 2, kind: input, shape index: {}]   ;;  %s1716_s3 = inlined_call_operand.vmem [shape: f32[1,128], index: 3, kind: input, shape index: {}]   ;;  %s1717_s4 = inlined_call_operand.vmem [shape: bf16[128,128], index: 4, kind: input, shape index: {}]   ;;  %s1718_s5 = inlined_call_operand.vmem [shape: f32[1,128], index: 5, kind: input, shape index: {}]   ;;  %s1719_s6 = inlined_call_operand.vmem [shape: f32[1,128], index: 6, kind: input, shape index: {}]   ;;  %s1720_s7 = inlined_call_operand.vmem [shape: bf16[128,64], index: 7, kind: input, shape index: {}]   ;;  %s1721_s8 = inlined_call_operand.vmem [shape: f32[1,64], index: 8, kind: input, shape index: {}]   ;;  %s1722_s9 = inlined_call_operand.vmem [shape: f32[1,64], index: 9, kind: input, shape index: {}]   ;;  %s1723_s10 = inlined_call_operand.vmem [shape: bf16[64,17], index: 10, kind: input, shape index: {}]   ;;  %s1724_s11 = inlined_call_operand.vmem [shape: f32[1,17], index: 11, kind: input, shape index: {}]   ;;  %s1725_s12 = inlined_call_operand.vmem [shape: f32[64,17], index: 12, kind: output, shape index: {}]  }
   0x1   :  { %s1510_s23 = smov 0   ;;  %s1512_s24 = smov 0  }
   0x2   :  { %s1514_s25 = smov 0  }
   0x3 LB: > { %s31_s26 = sadd.s32 1, %s1419_s23  ;;  %s34_s27 = sadd.s32 1, %s1423_s24  ;;  %s1427_s25 = sphi %s1514_s25, %s22_s25   ;;  %s1423_s24 = sphi %s1512_s24, %s1732_s24   ;;  %s1419_s23 = sphi %s1510_s23, %s1731_s23   ;;  %s1415_s22 = sphi %s1508_s22, %s1730_s22   ;;  %s1411_s21 = sphi %s1506_s21, %s1729_s21  }
   0x4   : > { %p32_p0 = scmp.ge.s32.totalorder %s31_s26, 4  ;;  %p1171_p1 = scmp.ge.s32.totalorder %s1427_s25, 1 }
   0x5   : > { %p387_p2 = scmp.lt.s32.totalorder %s1427_s25, 17 }
   0x6   : > { %s1734_s26 = smov (%p32_p0, %s31_s26), 0  ;;  %s1736_s27 = smov (!%p32_p0, %s34_s27), %s1423_s24 }
   0x7   : > { %p388_p3 = pnand %p1171_p1, %p387_p2  ;;  %p36_p4 = scmp.ge.s32.totalorder %s1736_s27, 4 }
   0x8   : > { %p433_p5 = scmp.eq.s32.totalorder (!%p388_p3), %s1415_s22, 0  ;;  %p443_p6 = scmp.eq.s32.totalorder (!%p388_p3), %s1415_s22, 3  ;;  %v455_v0 = vlaneseq (!%p388_p3)  ;;  %v1429_v6 = vmov (!%p388_p3), 0.0  }
   0x9   : > { %s1738_s27 = smov (%p36_p4, %s1736_s27), 0  ;;  %391 = sbr.rel (%p388_p3) target bundleno = 1141 (0x475), region = 68 }
   0xa   : > { %1726 = sst [smem:[#allocation9_spill]] %s1738_s27  ;;  %s1543_s28 = sshll.u32 (!%p388_p3), %s1411_s21, 4  ;;  %v456_v1 = vshrl.u32 (!%p388_p3), %v455_v0, 7 }
   0xb   : > { %p468_p7 = scmp.eq.s32.totalorder (!%p388_p3), %s1411_s21, 0  ;;  %v458_v2 = vstv (!%p388_p3), %s1543_s28 }
   0xc   : > { %v457_v3 = vadd.s32 (!%p388_p3), 8, %v456_v1  ;;  %v459_v4 = vadd.s32 (!%p388_p3), %v458_v2, %v456_v1 }
   0xd   : > { %p1553_p8 = pnand (!%p388_p3), %p468_p7, %p433_p5 }
   0xe   : > { %v460_v5 = vadd.s32 (!%p388_p3), %v458_v2, %v457_v3  ;;  %vm461_vm0 = vcmp.lt.s32.totalorder (!%p388_p3), %v459_v4, 50 }
   0xf   : > { %v1557_v7 = vsel (!%p388_p3), %vm461_vm0, 1.0, %v1429_v6 }
  0x10   : > { %s434_s29 = scalar_select %p433_p5, %s1411_s21, 0  ;;  %vm462_vm1 = vcmp.lt.s32.totalorder %v460_v5, 50 }
  0x11   : > { %s444_s30 = scalar_select %p443_p6, %s1411_s21, 0  ;;  %v1559_v8 = vsel %vm462_vm1, 1.0, %v1429_v6 }
  0x12   : > { %s1172_s13 = sshll.u32 %s434_s29, 1  ;;  %472 = sbr.rel (%p1553_p8) target bundleno = 25 (0x19), region = 72  ;;  %v1430_v9 = vmov (!%p1553_p8), 0.0  }
  0x13   : > { %p436_p9 = scmp.lt.s32.totalorder %s1172_s13, 7  ;;  %s1174_s15 = sshll.u32 %s444_s30, 1  ;;  %473 = vst [vmem:[#allocation2] sm:$0x1] (!%p1553_p8), %v1430_v9  ;;  %474 = vst [vmem:[#allocation3] sm:$0x1] (!%p1553_p8), %v1430_v9 }
  0x14   : > { %p446_p10 = scmp.lt.s32.totalorder %s1174_s15, 7 }
  0x15   : > { %s1740_s13 = smov (!%p436_p9, %s1172_s13), 7 }
  0x16   : > { %s1742_s15 = smov (!%p446_p10, %s1174_s15), 7  ;;  %s1173_s16 = sshll.u32 %s1740_s13, 2 }
  0x17   : > { %s1564_s19 = scalar_lea.vmem %s1713_s0, %s1173_s16  ;;  %s1175_s20 = sshll.u32 %s1742_s15, 3 }
  0x18   : > { %s1569_s27 = scalar_lea.vmem %s1725_s12, %s1175_s20 }
  0x19 PF: > { %p475_p11 = scmp.eq.s32.totalorder %s1415_s22, 1 }
  0x1b   : > { %p476_p12 = pnand %p475_p11, %p468_p7 }
  0x1c   : > { %v482_v10 = vld [vmem:[#allocation2] sm:$0x1] (!%p476_p12)  ;;  %v484_v11 = vld [vmem:[#allocation3] sm:$0x1] (!%p476_p12)  ;;  %v1431_v15 = vmov (!%p476_p12), 0.0  }
  0x1d   : > { %479 = sbr.rel (%p476_p12) target bundleno = 57 (0x39), region = 76  ;;  %v483_v12 = vmul.f32 (!%p476_p12), 0.02, %v482_v10  ;;  %v485_v13 = vmul.f32 (!%p476_p12), 0.02, %v484_v11 }
  0x1e   : > { %496 = vst [vmem:[#allocation4] sm:$0x1] (!%p476_p12), %v1431_v15  ;;  %497 = vst [vmem:[#allocation5] sm:$0x1] (!%p476_p12), %v1431_v15  ;;  %v480_v19 = vld [vmem:[%s1715_s2] sm:$0x1] (!%p476_p12) }
  0x1f   : > { %v486_v14 = vmul.f32 (!%p476_p12), %v483_v12, %v483_v12  ;;  %v481_v22 = vld [vmem:[%s1716_s3] sm:$0x1] (!%p476_p12) }
  0x21   : > { %v487_v16 = vsub.f32 (!%p476_p12), %v485_v13, %v486_v14 }
  0x23   : > { %v488_v17 = vmax.f32 (!%p476_p12), %v487_v16, 0.0 }
  0x25   : > { %v489_v18 = vadd.f32 1e-05, %v488_v17 }
  0x27   : > { %1355 = vrsqrt.f32 %v489_v18 }
  0x31   : > { %v1356_v20 = vpop.eup %1355 }
  0x32   : > { %v491_v21 = vmul.f32 %v1356_v20, %v480_v19 }
  0x34   : > { %492 = vst [vmem:[#allocation2] sm:$0x1] %v491_v21  ;;  %v493_v23 = vmul.f32 %v491_v21, %v483_v12 }
  0x36   : > { %v494_v24 = vsub.f32 %v481_v22, %v493_v23 }
  0x38   : > { %495 = vst [vmem:[#allocation3] sm:$0x1] %v494_v24 }
  0x39 PF: > { %p498_p13 = scmp.eq.s32.totalorder %s1415_s22, 2 }
  0x3b   : > { %p499_p0 = pnand %p498_p13, %p468_p7 }
  0x3c   : > { %v505_v25 = vld [vmem:[#allocation4] sm:$0x1] (!%p499_p0)  ;;  %v507_v26 = vld [vmem:[#allocation5] sm:$0x1] (!%p499_p0)  ;;  %vm519_vm2 = vcmask (!%p499_p0), 516096   ;;  %v1432_v30 = vmov (!%p499_p0), 0.0  }
  0x3d   : > { %502 = sbr.rel (%p499_p0) target bundleno = 89 (0x59), region = 80  ;;  %v506_v27 = vmul.f32 (!%p499_p0), 0.02, %v505_v25  ;;  %v508_v28 = vmul.f32 (!%p499_p0), 0.02, %v507_v26 }
  0x3e   : > { %520 = vst.msk [vmem:[#allocation6] sm:$0x1] (!%p499_p0), %vm519_vm2, %v1432_v30  ;;  %521 = vst.msk [vmem:[#allocation7] sm:$0x1] (!%p499_p0), %vm519_vm2, %v1432_v30  ;;  %v503_v34 = vld [vmem:[%s1718_s5] sm:$0x1] (!%p499_p0) }
  0x3f   : > { %v509_v29 = vmul.f32 (!%p499_p0), %v506_v27, %v506_v27  ;;  %v504_v37 = vld [vmem:[%s1719_s6] sm:$0x1] (!%p499_p0) }
  0x41   : > { %v510_v31 = vsub.f32 (!%p499_p0), %v508_v28, %v509_v29 }
  0x43   : > { %v511_v32 = vmax.f32 (!%p499_p0), %v510_v31, 0.0 }
  0x45   : > { %v512_v33 = vadd.f32 1e-05, %v511_v32 }
  0x47   : > { %1357 = vrsqrt.f32 %v512_v33 }
  0x51   : > { %v1358_v35 = vpop.eup %1357 }
  0x52   : > { %v514_v36 = vmul.f32 %v1358_v35, %v503_v34 }
  0x54   : > { %515 = vst [vmem:[#allocation4] sm:$0x1] %v514_v36  ;;  %v516_v38 = vmul.f32 %v514_v36, %v506_v27 }
  0x56   : > { %v517_v39 = vsub.f32 %v504_v37, %v516_v38 }
  0x58   : > { %518 = vst [vmem:[#allocation5] sm:$0x1] %v517_v39 }
  0x59 PF: > { %p523_p1 = pnand %p468_p7, %p443_p6 }
  0x5a   : > { %v529_v40 = vld [vmem:[#allocation6] sm:$0x1] (!%p523_p1)  ;;  %v531_v41 = vld [vmem:[#allocation7] sm:$0x1] (!%p523_p1)  ;;  %v527_v48 = vld [vmem:[%s1721_s8] sm:$0x1] (!%p523_p1) }
  0x5b   : > { %526 = sbr.rel (%p523_p1) target bundleno = 119 (0x77), region = 84  ;;  %v530_v42 = vmul.f32 (!%p523_p1), 0.02, %v529_v40  ;;  %v532_v43 = vmul.f32 (!%p523_p1), 0.02, %v531_v41  ;;  %vm539_vm3 = vcmask (!%p523_p1), 516096  }
  0x5c   : > { %v528_v51 = vld [vmem:[%s1722_s9] sm:$0x1] (!%p523_p1) }
  0x5d   : > { %v533_v44 = vmul.f32 (!%p523_p1), %v530_v42, %v530_v42 }
  0x5f   : > { %v534_v45 = vsub.f32 (!%p523_p1), %v532_v43, %v533_v44 }
  0x61   : > { %v535_v46 = vmax.f32 (!%p523_p1), %v534_v45, 0.0 }
  0x63   : > { %v536_v47 = vadd.f32 1e-05, %v535_v46 }
  0x65   : > { %1359 = vrsqrt.f32 %v536_v47 }
  0x6f   : > { %v1360_v49 = vpop.eup %1359 }
  0x70   : > { %v538_v50 = vmul.f32 %v1360_v49, %v527_v48 }
  0x72   : > { %540 = vst.msk [vmem:[#allocation6] sm:$0x1] %vm539_vm3, %v538_v50  ;;  %v541_v52 = vmul.f32 %v538_v50, %v530_v42 }
  0x74   : > { %v542_v53 = vsub.f32 %v528_v51, %v541_v52 }
  0x76   : > { %543 = vst.msk [vmem:[#allocation7] sm:$0x1] %vm539_vm3, %v542_v53 }
  0x77 PF: > { %p1179_p2 = scmp.ne.s32.totalorder %s1415_s22, 0 }
  0x78   : > { %vm565_vm4 = vcmask (!%p1179_p2), 1045504   ;;  %v1433_v54 = vmov (!%p1179_p2), 0.0   ;;  %v1361_v55 = vld [vmem:[%s1714_s1] sm:$0x3f] (!%p1179_p2)   ;;  %vm1434_vm5 = vmmov (!%p1179_p2), 0   ;;  %vm561_vm6 = vcmask (!%p1179_p2), 97280  }
  0x79   : > { %546 = sbr.rel (%p1179_p2) target bundleno = 360 (0x168), region = 88  ;;  %1245 = vmatprep.subr.bf16.mxu0 (!%p1179_p2), %v1433_v54  ;;  %1247 = vmatprep.mubr.msk.bf16.mxu0 (!%p1179_p2), %vm1434_vm5, %v1433_v54  ;;  %v567_v56 = vsel (!%p1179_p2), %vm565_vm4, %v1361_v55, 0  ;;  %v1362_v57 = vld [vmem:[%s1564_s19] sm:$0xff] (!%p1179_p2)   ;;  %s635_s17 = sshra.s32 (!%p1179_p2), %s1543_s28, 4 }
  0x7a   : > { %1246 = vmatpush3.bf16.msra.mxu0 (!%p1179_p2), %v567_v56  ;;  %s1183_s18 = sshll.u32 (!%p1179_p2), %s635_s17, 3  ;;  %v612_v16 = vld [vmem:[#allocation2] sm:$0x1] (!%p1179_p2)  ;;  %v622_v19 = vld [vmem:[#allocation3] sm:$0x1] (!%p1179_p2) }
  0x7b   : > { %s638_s20 = scalar_lea.vmem (!%p1179_p2), [#allocation8], %s1183_s18 }
  0x7d   : > { %1248 = vmatmul.mubr.msk.bf16.vlgmr.msra.gmra.mrb[0].mxu0 (!%p1179_p2), %vm561_vm6, %v1362_v57 }
 0x150   : > { %v603_v58 = vpop.f32.mrb[0].mxu0 }
 0x151   : > { %v610_v59 = vmul.f32 %v1557_v7, %v603_v58  ;;  %v1249_v60 = vpop.f32.mrb[1].mxu0 }
 0x152   : > { %v606_v61 = vpop.f32.mrb[2].mxu0 }
 0x153   : > { %v611_v62 = vmul.f32 %v1559_v8, %v606_v61  ;;  %v634_v63 = vpack.c.bf16 %v606_v61, %v603_v58  ;;  %v1250_v0 = vpop.f32.mrb[3].mxu0  ;;  %v623_v1 = vmul.f32 %v610_v59, %v603_v58 }
 0x155   : > { %v613_v2 = vadd.f32 %v611_v62, %v610_v59  ;;  %v624_v3 = vmul.f32 %v611_v62, %v606_v61  ;;  %639 = vst [vmem:[%s638_s20] sm:$0xff] %v634_v63 }
 0x157   : > { %v614_v4 = vrot.slane %v613_v2, 4  ;;  %v625_v5 = vadd.f32 %v624_v3, %v623_v1 }
 0x159   : > { %v615_v6 = vadd.f32 %v614_v4, %v613_v2  ;;  %v626_v9 = vrot.slane %v625_v5, 4 }
 0x15b   : > { %v616_v10 = vrot.slane %v615_v6, 2  ;;  %v627_v11 = vadd.f32 %v626_v9, %v625_v5 }
 0x15d   : > { %v617_v12 = vadd.f32 %v616_v10, %v615_v6  ;;  %v628_v13 = vrot.slane %v627_v11, 2 }
 0x15f   : > { %v618_v14 = vrot.slane %v617_v12, 1  ;;  %v629_v15 = vadd.f32 %v628_v13, %v627_v11 }
 0x161   : > { %v619_v17 = vadd.f32 %v618_v14, %v617_v12  ;;  %v630_v18 = vrot.slane %v629_v15, 1 }
 0x163   : > { %v620_v20 = vadd.f32 %v619_v17, %v612_v16  ;;  %v631_v21 = vadd.f32 %v630_v18, %v629_v15 }
 0x165   : > { %621 = vst [vmem:[#allocation2] sm:$0x1] %v620_v20  ;;  %v632_v22 = vadd.f32 %v631_v21, %v622_v19 }
 0x167   : > { %633 = vst [vmem:[#allocation3] sm:$0x1] %v632_v22 }
 0x168 PF: > { %p1184_p3 = scmp.ne.s32.totalorder %s1415_s22, 1 }
 0x169   : > { %v1363_v23 = vld [vmem:[%s1717_s4] sm:$0xff] (!%p1184_p3)   ;;  %v1435_v24 = vmov (!%p1184_p3), 0.0   ;;  %v1364_v25 = vld [vmem:[%s1717_s4 + $0x8] sm:$0xff] (!%p1184_p3)   ;;  %vm1436_vm7 = vmmov (!%p1184_p3), 0   ;;  %s643_s14 = sshra.s32 (!%p1184_p3), %s1543_s28, 4  ;;  %v1365_v26 = vld [vmem:[%s1717_s4 + $0x10] sm:$0xff] (!%p1184_p3)  }
 0x16a   : > { %642 = sbr.rel (%p1184_p3) target bundleno = 629 (0x275), region = 92  ;;  %1251 = vmatprep.subr.bf16.mxu0 (!%p1184_p3), %v1435_v24  ;;  %1267 = vmatprep.mubr.msk.bf16.mxu0 (!%p1184_p3), %vm1436_vm7, %v1435_v24  ;;  %s1617_s21 = sshll.u32 (!%p1184_p3), %s643_s14, 3  ;;  %v1366_v31 = vld [vmem:[%s1717_s4 + $0x18] sm:$0xff] (!%p1184_p3)   ;;  %v1367_v37 = vld [vmem:[%s1717_s4 + $0x20] sm:$0xff] (!%p1184_p3)   ;;  %v1368_v39 = vld [vmem:[%s1717_s4 + $0x28] sm:$0xff] (!%p1184_p3)  }
 0x16b   : > { %1252 = vmatpush3.bf16.msra.mxu0 (!%p1184_p3), %v1363_v23  ;;  %s646_s17 = scalar_lea.vmem (!%p1184_p3), [#allocation8], %s1617_s21  ;;  %v1369_v40 = vld [vmem:[%s1717_s4 + $0x30] sm:$0xff] (!%p1184_p3)   ;;  %v1370_v41 = vld [vmem:[%s1717_s4 + $0x38] sm:$0xff] (!%p1184_p3)   ;;  %v777_v63 = vld [vmem:[#allocation4] sm:$0x1] (!%p1184_p3) }
 0x16c   : > { %1253 = vmatprep.subr.bf16.mxu0 (!%p1184_p3), %v1435_v24  ;;  %v647_v27 = vld [vmem:[%s646_s17] sm:$0xff] (!%p1184_p3) }
 0x16d   : > { %v1186_v28 = vld [vmem:[#allocation2] ss:$0 sm:$0xff] (!%p1184_p3)  ;;  %v649_v29 = vunpack.c.l.bf16 (!%p1184_p3), %v647_v27  ;;  %v650_v30 = vunpack.c.h.bf16 (!%p1184_p3), %v647_v27  ;;  %v787_v2 = vld [vmem:[#allocation5] sm:$0x1] (!%p1184_p3) }
 0x16e   : > { %v1187_v32 = vld [vmem:[#allocation3] ss:$0 sm:$0xff] (!%p1184_p3) }
 0x16f   : > { %1254 = vmatpush3.bf16.msra.mxu0 (!%p1184_p3), %v1364_v25  ;;  %v657_v33 = vmul.f32 (!%p1184_p3), %v1186_v28, %v649_v29  ;;  %v658_v34 = vmul.f32 (!%p1184_p3), %v1186_v28, %v650_v30 }
 0x170   : > { %1255 = vmatprep.subr.bf16.mxu0 (!%p1184_p3), %v1435_v24 }
 0x171   : > { %v666_v35 = vadd.f32 %v1187_v32, %v657_v33  ;;  %v667_v36 = vadd.f32 %v1187_v32, %v658_v34 }
 0x173   : > { %1256 = vmatpush3.bf16.msra.mxu0 %v1365_v26  ;;  %v668_v38 = vpack.c.bf16 %v667_v36, %v666_v35 }
 0x174   : > { %1257 = vmatprep.subr.bf16.mxu0 %v1435_v24 }
 0x175   : > { %1371 = vtanh.bf16 %v668_v38 }
 0x177   : > { %1258 = vmatpush3.bf16.msra.mxu0 %v1366_v31 }
 0x178   : > { %1259 = vmatprep.subr.bf16.mxu0 %v1435_v24 }
 0x17b   : > { %1260 = vmatpush3.bf16.msra.mxu0 %v1367_v37 }
 0x17c   : > { %1261 = vmatprep.subr.bf16.mxu0 %v1435_v24 }
 0x17f   : > { %1262 = vmatpush3.bf16.msra.mxu0 %v1368_v39 }
 0x180   : > { %1263 = vmatprep.subr.bf16.mxu0 %v1435_v24  ;;  %v1372_v42 = vpop.eup %1371 }
 0x183   : > { %1264 = vmatpush3.bf16.msra.mxu0 %v1369_v40 }
 0x184   : > { %1265 = vmatprep.subr.bf16.mxu0 %v1435_v24 }
 0x187   : > { %1266 = vmatpush3.bf16.msra.mxu0 %v1370_v41 }
 0x18a   : > { %1268 = vmatmul.mubr.bf16.vlgmr.msra.gmra.mrb[0].mxu0 %v1372_v42 }
 0x25d   : > { %v768_v43 = vpop.f32.mrb[0].mxu0 }
 0x25e   : > { %v775_v44 = vmul.f32 %v1557_v7, %v768_v43  ;;  %v1269_v45 = vpop.f32.mrb[1].mxu0 }
 0x25f   : > { %v771_v46 = vpop.f32.mrb[2].mxu0 }
 0x260   : > { %v776_v47 = vmul.f32 %v1559_v8, %v771_v46  ;;  %v799_v48 = vpack.c.bf16 %v771_v46, %v768_v43  ;;  %v1270_v49 = vpop.f32.mrb[3].mxu0  ;;  %v788_v50 = vmul.f32 %v775_v44, %v768_v43 }
 0x262   : > { %v778_v51 = vadd.f32 %v776_v47, %v775_v44  ;;  %v789_v52 = vmul.f32 %v776_v47, %v771_v46  ;;  %800 = vst [vmem:[%s646_s17] sm:$0xff] %v799_v48 }
 0x264   : > { %v779_v53 = vrot.slane %v778_v51, 4  ;;  %v790_v54 = vadd.f32 %v789_v52, %v788_v50 }
 0x266   : > { %v780_v55 = vadd.f32 %v779_v53, %v778_v51  ;;  %v791_v56 = vrot.slane %v790_v54, 4 }
 0x268   : > { %v781_v57 = vrot.slane %v780_v55, 2  ;;  %v792_v58 = vadd.f32 %v791_v56, %v790_v54 }
 0x26a   : > { %v782_v59 = vadd.f32 %v781_v57, %v780_v55  ;;  %v793_v60 = vrot.slane %v792_v58, 2 }
 0x26c   : > { %v783_v61 = vrot.slane %v782_v59, 1  ;;  %v794_v62 = vadd.f32 %v793_v60, %v792_v58 }
 0x26e   : > { %v784_v0 = vadd.f32 %v783_v61, %v782_v59  ;;  %v795_v1 = vrot.slane %v794_v62, 1 }
 0x270   : > { %v785_v3 = vadd.f32 %v784_v0, %v777_v63  ;;  %v796_v4 = vadd.f32 %v795_v1, %v794_v62 }
 0x272   : > { %786 = vst [vmem:[#allocation4] sm:$0x1] %v785_v3  ;;  %v797_v5 = vadd.f32 %v796_v4, %v787_v2 }
 0x274   : > { %798 = vst [vmem:[#allocation5] sm:$0x1] %v797_v5 }
 0x275 PF: > { %p1196_p4 = scmp.ne.s32.totalorder %s1415_s22, 2 }
 0x276   : > { %v1373_v6 = vld [vmem:[%s1720_s7] sm:$0xff] (!%p1196_p4)   ;;  %v1437_v9 = vmov (!%p1196_p4), 0.0   ;;  %v1374_v10 = vld [vmem:[%s1720_s7 + $0x8] sm:$0xff] (!%p1196_p4)   ;;  %vm1438_vm8 = vmmov (!%p1196_p4), 0   ;;  %s804_s29 = sshra.s32 (!%p1196_p4), %s1543_s28, 4  ;;  %v1375_v11 = vld [vmem:[%s1720_s7 + $0x10] sm:$0xff] (!%p1196_p4)  }
 0x277   : > { %803 = sbr.rel (%p1196_p4) target bundleno = 899 (0x383), region = 96  ;;  %1271 = vmatprep.subr.bf16.mxu0 (!%p1196_p4), %v1437_v9  ;;  %1287 = vmatprep.mubr.msk.bf16.mxu0 (!%p1196_p4), %vm1438_vm8, %v1437_v9  ;;  %s1652_s30 = sshll.u32 (!%p1196_p4), %s804_s29, 3  ;;  %v1376_v16 = vld [vmem:[%s1720_s7 + $0x18] sm:$0xff] (!%p1196_p4)   ;;  %v1377_v22 = vld [vmem:[%s1720_s7 + $0x20] sm:$0xff] (!%p1196_p4)   ;;  %v1378_v24 = vld [vmem:[%s1720_s7 + $0x28] sm:$0xff] (!%p1196_p4)   ;;  %vm939_vm9 = vcmask (!%p1196_p4), 523264  }
 0x278   : > { %1272 = vmatpush3.bf16.msra.mxu0 (!%p1196_p4), %v1373_v6  ;;  %s807_s15 = scalar_lea.vmem (!%p1196_p4), [#allocation8], %s1652_s30  ;;  %v1379_v25 = vld [vmem:[%s1720_s7 + $0x30] sm:$0xff] (!%p1196_p4)   ;;  %v1380_v26 = vld [vmem:[%s1720_s7 + $0x38] sm:$0xff] (!%p1196_p4)   ;;  %v938_v50 = vld [vmem:[#allocation6] sm:$0x1] (!%p1196_p4)  ;;  %vm950_vm10 = vcmask (!%p1196_p4), 516096  }
 0x279   : > { %1273 = vmatprep.subr.bf16.mxu0 (!%p1196_p4), %v1437_v9  ;;  %v808_v12 = vld [vmem:[%s807_s15] sm:$0xff] (!%p1196_p4) }
 0x27a   : > { %v1198_v13 = vld [vmem:[#allocation4] ss:$0 sm:$0xff] (!%p1196_p4)  ;;  %v810_v14 = vunpack.c.l.bf16 (!%p1196_p4), %v808_v12  ;;  %v811_v15 = vunpack.c.h.bf16 (!%p1196_p4), %v808_v12  ;;  %v952_v53 = vld [vmem:[#allocation7] sm:$0x1] (!%p1196_p4) }
 0x27b   : > { %v1199_v17 = vld [vmem:[#allocation5] ss:$0 sm:$0xff] (!%p1196_p4) }
 0x27c   : > { %1274 = vmatpush3.bf16.msra.mxu0 (!%p1196_p4), %v1374_v10  ;;  %v818_v18 = vmul.f32 (!%p1196_p4), %v1198_v13, %v810_v14  ;;  %v819_v19 = vmul.f32 (!%p1196_p4), %v1198_v13, %v811_v15 }
 0x27d   : > { %1275 = vmatprep.subr.bf16.mxu0 (!%p1196_p4), %v1437_v9 }
 0x27e   : > { %v827_v20 = vadd.f32 %v1199_v17, %v818_v18  ;;  %v828_v21 = vadd.f32 %v1199_v17, %v819_v19 }
 0x280   : > { %1276 = vmatpush3.bf16.msra.mxu0 %v1375_v11  ;;  %v829_v23 = vpack.c.bf16 %v828_v21, %v827_v20 }
 0x281   : > { %1277 = vmatprep.subr.bf16.mxu0 %v1437_v9 }
 0x282   : > { %1381 = vtanh.bf16 %v829_v23 }
 0x284   : > { %1278 = vmatpush3.bf16.msra.mxu0 %v1376_v16 }
 0x285   : > { %1279 = vmatprep.subr.bf16.mxu0 %v1437_v9 }
 0x288   : > { %1280 = vmatpush3.bf16.msra.mxu0 %v1377_v22 }
 0x289   : > { %1281 = vmatprep.subr.bf16.mxu0 %v1437_v9 }
 0x28c   : > { %1282 = vmatpush3.bf16.msra.mxu0 %v1378_v24 }
 0x28d   : > { %1283 = vmatprep.subr.bf16.mxu0 %v1437_v9  ;;  %v1382_v27 = vpop.eup %1381 }
 0x290   : > { %1284 = vmatpush3.bf16.msra.mxu0 %v1379_v25 }
 0x291   : > { %1285 = vmatprep.subr.bf16.mxu0 %v1437_v9 }
 0x294   : > { %1286 = vmatpush3.bf16.msra.mxu0 %v1380_v26 }
 0x297   : > { %1288 = vmatmul.mubr.bf16.vlgmr.msra.gmra.mrb[0].mxu0 %v1382_v27 }
 0x36a   : > { %v929_v28 = vpop.f32.mrb[0].mxu0 }
 0x36b   : > { %v936_v29 = vmul.f32 %v1557_v7, %v929_v28  ;;  %v1289_v30 = vpop.f32.mrb[1].mxu0 }
 0x36c   : > { %v932_v31 = vpop.f32.mrb[2].mxu0 }
 0x36d   : > { %v953_v32 = vmul.f32 %v936_v29, %v929_v28  ;;  %v937_v33 = vmul.f32 %v1559_v8, %v932_v31  ;;  %v966_v34 = vpack.c.bf16 %v932_v31, %v929_v28  ;;  %v1290_v35 = vpop.f32.mrb[3].mxu0  ;;  %v940_v36 = vsel %vm939_vm9, %v936_v29, 0.0 }
 0x36f   : > { %v941_v37 = vsel %vm939_vm9, %v937_v33, 0.0  ;;  %v954_v38 = vmul.f32 %v937_v33, %v932_v31  ;;  %967 = vst.msk [vmem:[%s807_s15] sm:$0xff] %vm939_vm9, %v966_v34  ;;  %v955_v40 = vsel %vm939_vm9, %v953_v32, 0.0 }
 0x370   : > { %v942_v39 = vadd.f32 %v941_v37, %v940_v36 }
 0x371   : > { %v956_v41 = vsel %vm939_vm9, %v954_v38, 0.0 }
 0x372   : > { %v943_v42 = vrot.slane %v942_v39, 4  ;;  %v957_v43 = vadd.f32 %v956_v41, %v955_v40 }
 0x374   : > { %v944_v44 = vadd.f32 %v943_v42, %v942_v39  ;;  %v958_v7 = vrot.slane %v957_v43, 4 }
 0x376   : > { %v945_v45 = vrot.slane %v944_v44, 2  ;;  %v959_v46 = vadd.f32 %v958_v7, %v957_v43 }
 0x378   : > { %v946_v47 = vadd.f32 %v945_v45, %v944_v44  ;;  %v960_v48 = vrot.slane %v959_v46, 2 }
 0x37a   : > { %v947_v49 = vrot.slane %v946_v47, 1  ;;  %v961_v8 = vadd.f32 %v960_v48, %v959_v46 }
 0x37c   : > { %v948_v51 = vadd.f32 %v947_v49, %v946_v47  ;;  %v962_v52 = vrot.slane %v961_v8, 1 }
 0x37e   : > { %v949_v54 = vadd.f32 %v948_v51, %v938_v50  ;;  %v963_v55 = vadd.f32 %v962_v52, %v961_v8 }
 0x380   : > { %951 = vst.msk [vmem:[#allocation6] sm:$0x1] %vm950_vm10, %v949_v54  ;;  %v964_v56 = vadd.f32 %v963_v55, %v952_v53 }
 0x382   : > { %965 = vst.msk [vmem:[#allocation7] sm:$0x1] %vm950_vm10, %v964_v56 }
 0x383 PF: > { %p1208_p5 = scmp.ne.s32.totalorder %s1415_s22, 3 }
 0x384   : > { %v1383_v57 = vld [vmem:[%s1723_s10] sm:$0xff] (!%p1208_p5)   ;;  %v1439_v58 = vmov (!%p1208_p5), 0.0   ;;  %v1384_v59 = vld [vmem:[%s1723_s10 + $0x8] sm:$0xff] (!%p1208_p5)   ;;  %vm1440_vm11 = vmmov (!%p1208_p5), 0   ;;  %s971_s17 = sshra.s32 (!%p1208_p5), %s1543_s28, 4  ;;  %v1385_v62 = vld [vmem:[%s1723_s10 + $0x10] sm:$0xff] (!%p1208_p5)  }
 0x385   : > { %970 = sbr.rel (%p1208_p5) target bundleno = 1141 (0x475), region = 100  ;;  %1291 = vmatprep.subr.bf16.mxu0 (!%p1208_p5), %v1439_v58  ;;  %1299 = vmatprep.mubr.msk.bf16.mxu0 (!%p1208_p5), %vm1440_vm11, %v1439_v58  ;;  %s1209_s20 = sshll.u32 (!%p1208_p5), %s971_s17, 3  ;;  %v1386_v4 = vld [vmem:[%s1723_s10 + $0x18] sm:$0xff] (!%p1208_p5)   ;;  %vm1037_vm12 = vcmask (!%p1208_p5), 523264   ;;  %v1212_v11 = vld [vmem:[%s1724_s11] ss:$0 sm:$0xff] (!%p1208_p5) }
 0x386   : > { %1292 = vmatpush3.bf16.msra.mxu0 (!%p1208_p5), %v1383_v57  ;;  %s974_s19 = scalar_lea.vmem (!%p1208_p5), [#allocation8], %s1209_s20  ;;  %vm1082_vm13 = vcmask (!%p1208_p5), 138240  }
 0x387   : > { %1293 = vmatprep.subr.bf16.mxu0 (!%p1208_p5), %v1439_v58  ;;  %v975_v60 = vld [vmem:[%s974_s19] sm:$0xff] (!%p1208_p5) }
 0x388   : > { %v1210_v61 = vld [vmem:[#allocation6] ss:$0 sm:$0xff] (!%p1208_p5)  ;;  %v977_v63 = vunpack.c.l.bf16 (!%p1208_p5), %v975_v60  ;;  %v978_v0 = vunpack.c.h.bf16 (!%p1208_p5), %v975_v60 }
 0x389   : > { %v1211_v1 = vld [vmem:[#allocation7] ss:$0 sm:$0xff] (!%p1208_p5) }
 0x38a   : > { %1294 = vmatpush3.bf16.msra.mxu0 (!%p1208_p5), %v1384_v59  ;;  %v985_v2 = vmul.f32 (!%p1208_p5), %v1210_v61, %v977_v63  ;;  %v986_v3 = vmul.f32 (!%p1208_p5), %v1210_v61, %v978_v0 }
 0x38b   : > { %1295 = vmatprep.subr.bf16.mxu0 (!%p1208_p5), %v1439_v58 }
 0x38c   : > { %v994_v5 = vadd.f32 %v1211_v1, %v985_v2  ;;  %v995_v6 = vadd.f32 %v1211_v1, %v986_v3 }
 0x38e   : > { %1296 = vmatpush3.bf16.msra.mxu0 %v1385_v62  ;;  %v996_v9 = vpack.c.bf16 %v995_v6, %v994_v5 }
 0x38f   : > { %1297 = vmatprep.subr.bf16.mxu0 %v1439_v58 }
 0x390   : > { %1387 = vtanh.bf16 %v996_v9 }
 0x392   : > { %1298 = vmatpush3.bf16.msra.mxu0 %v1386_v4 }
 0x39b   : > { %v1388_v10 = vpop.eup %1387 }
 0x39c   : > { %1300 = vmatmul.mubr.msk.bf16.vlgmr.msra.gmra.mrb[0].mxu0 %vm1037_vm12, %v1388_v10 }
 0x46f   : > { %v1075_v12 = vpop.f32.mrb[0].mxu0 }
 0x470   : > { %v1076_v13 = vadd.f32 %v1212_v11, %v1075_v12  ;;  %v1301_v14 = vpop.f32.mrb[1].mxu0 }
 0x471   : > { %v1078_v15 = vpop.f32.mrb[2].mxu0 }
 0x472   : > { %1083 = vst.msk [vmem:[%s1569_s27] sm:$0xff] %vm1082_vm13, %v1076_v13  ;;  %v1079_v16 = vadd.f32 %v1212_v11, %v1078_v15  ;;  %v1302_v17 = vpop.f32.mrb[3].mxu0 }
 0x474   : > { %1084 = vst.msk [vmem:[%s1569_s27 + $0x8] sm:$0xff] %vm1082_vm13, %v1079_v16 }
 0x475 PF: > { %s22_s25 = sadd.s32 1, %s1427_s25   ;;  %s1728_s30 = sld [smem:[#allocation9_spill]] }
 0x476   : > { %p19_p6 = scmp.ge.s32.totalorder %s22_s25, 18   ;;  %s1729_s21 = smov %s1419_s23 }
 0x477   : > { %s1730_s22 = smov %s1423_s24  ;;  %s1731_s23 = smov %s1734_s26 }
 0x478   :  { %21 = sbr.rel (!%p19_p6) target bundleno = 3 (0x3), region = 134 }
 0x47b   : > { %s1732_s24 = smov %s1728_s30 }

</bundles_post_ra>
